<compile_context>
chip_gen: v5e
topology: v5e:2x2
jax: 0.10.0
libtpu: 0.0.40
codegen_flags: <defaults>
</compile_context>

<pallas_src>
import functools

import jax
import jax.numpy as jnp
from jax.experimental import pallas as pl
from jax.experimental.pallas import tpu as pltpu

LANES = 128
SUB = 128           # rows per in-kernel compute slab (f32 [128,128] = 16 vregs)


def _round_up(n, m):
    return ((n + m - 1) // m) * m


def dqn_kernel(x_ref, w1_ref, b1_ref, w2_ref, b2_ref, w3_ref, b3_ref, o_ref,
               *, sub, tb, num_sub):
    in_feat = x_ref.shape[1]
    step_base = pl.program_id(0) * tb     # row offset of this grid step in resident x

    def slab(s, carry):
        xb = pl.multiple_of(step_base + s * sub, sub)   # row offset into resident x
        ob = pl.multiple_of(s * sub, sub)               # row offset into this step's out tile
        x = x_ref[pl.ds(xb, sub), :]                    # [sub, IN] f32 (IN = 2)

        # ---- layer 1: contraction depth = IN (=2) -> VPU broadcast-FMAs, no MXU.
        acc = x[:, 0:1] * w1_ref[0:1, :]
        for k in range(1, in_feat):                     # static & tiny -> fully unrolled
            acc = acc + x[:, k:k + 1] * w1_ref[k:k + 1, :]
        h1 = jnp.maximum(acc + b1_ref[...], 0.0)        # bias + ReLU in f32

        # ---- layer 2: [sub,128] @ [128,128] -> one MXU tile, f32 accumulation.
        h2 = jnp.dot(h1.astype(w2_ref.dtype), w2_ref[...],
                     preferred_element_type=jnp.float32) + b2_ref[...]
        h2 = jnp.maximum(h2, 0.0)

        # ---- layer 3: [sub,128] @ [128,128]; 128-lane padded output -> unmasked store.
        out = jnp.dot(h2.astype(w3_ref.dtype), w3_ref[...],
                      preferred_element_type=jnp.float32) + b3_ref[...]
        o_ref[pl.ds(ob, sub), :] = out.astype(o_ref.dtype)
        return carry

    jax.lax.fori_loop(0, num_sub, slab, 0, unroll=True)


def prepare_params(params, matmul_dtype=jnp.float32):
    """One-time offline prep: pad hidden/output dims to 128 lanes (exact:
    relu(0)=0 and zero weight rows/cols contribute nothing) and optionally
    cast the MXU-bound weights (layers 2/3) to `matmul_dtype`.  Default is
    f32 so the kernel matches the f32 reference (DQN argmax sensitivity)."""
    w1, b1 = params["w1"], params["b1"]
    w2, b2 = params["w2"], params["b2"]
    w3, b3 = params["w3"], params["b3"]
    in_f, hid = w1.shape
    out_f = w3.shape[1]
    H = _round_up(max(hid, LANES), LANES)
    O = _round_up(max(out_f, LANES), LANES)

    def pad2(a, rows, cols):
        return jnp.pad(a, ((0, rows - a.shape[0]), (0, cols - a.shape[1])))

    return {
        "w1": pad2(w1, in_f, H).astype(jnp.float32),   # VPU layer: keep f32
        "b1": pad2(b1, 1, H).astype(jnp.float32),
        "w2": pad2(w2, H, H).astype(matmul_dtype),
        "b2": pad2(b2, 1, H).astype(jnp.float32),
        "w3": pad2(w3, H, O).astype(matmul_dtype),
        "b3": pad2(b3, 1, O).astype(jnp.float32),
    }


def dqn_forward(x, padded, *, out_size, batch_tile=256):
    """x: [B, input_size] f32.  padded: output of prepare_params().

    batch_tile rows are processed per grid step (as batch_tile//128 in-kernel
    slabs).  Pick batch_tile so the grid length matches the TensorCore count:
    v7x (2 TCs): even grid, e.g. batch_tile=256 for B=512;
    v5e/v6e (1 TC): batch_tile >= B collapses to grid=(1,)."""
    w1, b1, w2, b2, w3, b3 = (padded[k] for k in ("w1", "b1", "w2", "b2", "w3", "b3"))
    B, IN = x.shape
    O = w3.shape[1]

    TB = min(_round_up(batch_tile, SUB), _round_up(B, SUB))   # batch rows per grid step
    Bp = _round_up(B, TB)
    if Bp != B:
        x = jnp.pad(x, ((0, Bp - B), (0, 0)))
    grid = (Bp // TB,)
    num_sub = TB // SUB

    kernel = functools.partial(dqn_kernel, sub=SUB, tb=TB, num_sub=num_sub)

    # Constant block index -> fetched once, VMEM-resident across all grid steps.
    resident = lambda a: pl.BlockSpec(a.shape, lambda i: (0, 0))

    out_padded = pl.pallas_call(
        kernel,
        out_shape=jax.ShapeDtypeStruct((Bp, O), jnp.float32),
        grid=grid,
        in_specs=[resident(x),            # x resident too (~Bp*IN*4 bytes)
                  resident(w1), resident(b1),
                  resident(w2), resident(b2),
                  resident(w3), resident(b3)],
        out_specs=pl.BlockSpec((TB, O), lambda i: (i, 0)),    # lane-dense out tile
        compiler_params=pltpu.CompilerParams(
            dimension_semantics=("parallel",)),               # v7x: 2 TCs split the grid
    )(x, w1, b1, w2, b2, w3, b3)

    return out_padded[:B, :out_size]


def init_params(key, input_size, hidden, output_size):
    """Deterministic init mimicking PyTorch's default U(-1/sqrt(fan_in), +).
    Weights stored as [in, out] (transposed vs. torch's [out, in])."""
    def linear(k, fan_in, fan_out):
        kw, kb = jax.random.split(k)
        bound = 1.0 / jnp.sqrt(jnp.float32(fan_in))
        w = jax.random.uniform(kw, (fan_in, fan_out), jnp.float32, -bound, bound)
        b = jax.random.uniform(kb, (1, fan_out), jnp.float32, -bound, bound)
        return w, b

    k1, k2, k3 = jax.random.split(key, 3)
    w1, b1 = linear(k1, input_size, hidden)
    w2, b2 = linear(k2, hidden, hidden)
    w3, b3 = linear(k3, hidden, output_size)
    return {"w1": w1, "b1": b1, "w2": w2, "b2": b2, "w3": w3, "b3": b3}


def dqn_reference(x, p):
    # Keep the reference at true f32 (TPU's default dot precision is lossy bf16).
    hp = jax.lax.Precision.HIGHEST
    h1 = jnp.maximum(jnp.dot(x, p["w1"], precision=hp) + p["b1"], 0.0)
    h2 = jnp.maximum(jnp.dot(h1, p["w2"], precision=hp) + p["b2"], 0.0)
    return jnp.dot(h2, p["w3"], precision=hp) + p["b3"]


if __name__ == "__main__":
    input_size = 2     # module-level constant in the reference script
    hidden = 24        # nn.Linear(input_size, 24) / nn.Linear(24, 24)
    output_size = 4    # e.g. 4 discrete actions
    batch = 512        # replay-style batch: grid=(2,) with batch_tile=256 (v7x-even)

    key = jax.random.PRNGKey(0)
    kx, kp = jax.random.split(key)
    x = jax.random.normal(kx, (batch, input_size), jnp.float32)
    params = init_params(kp, input_size, hidden, output_size)
    padded = prepare_params(params)        # f32 matmul weights -> matches reference

    # v5e/v6e (single TC): batch_tile=batch gives grid=(1,) — one prologue total.
    fwd = jax.jit(functools.partial(dqn_forward,
                                    out_size=output_size, batch_tile=256))
    out = jax.block_until_ready(fwd(x, padded))

    ref = dqn_reference(x, params)         # pure f32 reference
    assert out.shape == (batch, output_size), out.shape
    max_err = float(jnp.max(jnp.abs(out - ref)))
    assert jnp.allclose(out, ref, atol=2e-2, rtol=2e-2), \
        f"mismatch vs reference, max abs err {max_err}"

    print("KERNEL_OK")
</pallas_src>

<mosaic_0001>
module attributes {stable_mosaic.version = 11 : i64} {
  func.func @dqn_kernel(%arg0: i32, %arg1: memref<512x2xf32, #tpu.memory_space<vmem>>, %arg2: memref<2x128xf32, #tpu.memory_space<vmem>>, %arg3: memref<1x128xf32, #tpu.memory_space<vmem>>, %arg4: memref<128x128xf32, #tpu.memory_space<vmem>>, %arg5: memref<1x128xf32, #tpu.memory_space<vmem>>, %arg6: memref<128x128xf32, #tpu.memory_space<vmem>>, %arg7: memref<1x128xf32, #tpu.memory_space<vmem>>, %arg8: memref<256x128xf32, #tpu.memory_space<vmem>>) attributes {dimension_semantics = [#tpu.dimension_semantics<parallel>], iteration_bounds = array<i64: 2>, scalar_prefetch = 0 : i64, scratch_operands = 0 : i64, tpu.core_type = #tpu.core_type<tc>, window_params = [{pipeline_mode = #tpu.pipeline_mode<synchronous>, transform_indices = @transform_0, window_bounds = array<i64: 512, 2>}, {pipeline_mode = #tpu.pipeline_mode<synchronous>, transform_indices = @transform_1, window_bounds = array<i64: 2, 128>}, {pipeline_mode = #tpu.pipeline_mode<synchronous>, transform_indices = @transform_2, window_bounds = array<i64: 1, 128>}, {pipeline_mode = #tpu.pipeline_mode<synchronous>, transform_indices = @transform_3, window_bounds = array<i64: 128, 128>}, {pipeline_mode = #tpu.pipeline_mode<synchronous>, transform_indices = @transform_4, window_bounds = array<i64: 1, 128>}, {pipeline_mode = #tpu.pipeline_mode<synchronous>, transform_indices = @transform_5, window_bounds = array<i64: 128, 128>}, {pipeline_mode = #tpu.pipeline_mode<synchronous>, transform_indices = @transform_6, window_bounds = array<i64: 1, 128>}, {transform_indices = @transform_7, window_bounds = array<i64: 256, 128>}]} {
    %c256_i32 = arith.constant 256 : i32
    %0 = arith.muli %arg0, %c256_i32 : i32
    %c0_i32 = arith.constant 0 : i32
    %c128_i32 = arith.constant 128 : i32
    %1 = arith.muli %c0_i32, %c128_i32 : i32
    %2 = arith.addi %0, %1 : i32
    %3 = tpu.assume_multiple %2, 128 : i32
    %c128_i32_0 = arith.constant 128 : i32
    %4 = arith.muli %c0_i32, %c128_i32_0 : i32
    %5 = tpu.assume_multiple %4, 128 : i32
    %6 = arith.index_cast %3 : i32 to index
    %c0 = arith.constant 0 : index
    %7 = vector.load %arg1[%6, %c0] : memref<512x2xf32, #tpu.memory_space<vmem>>, vector<128x2xf32>
    %8 = vector.extract_strided_slice %7 {offsets = [0, 0], sizes = [128, 1], strides = [1, 1]} : vector<128x2xf32> to vector<128x1xf32>
    %c0_1 = arith.constant 0 : index
    %c0_2 = arith.constant 0 : index
    %9 = vector.load %arg2[%c0_1, %c0_2] : memref<2x128xf32, #tpu.memory_space<vmem>>, vector<1x128xf32>
    %10 = vector.broadcast %8 : vector<128x1xf32> to vector<128x128xf32>
    %11 = vector.broadcast %9 : vector<1x128xf32> to vector<128x128xf32>
    %12 = arith.mulf %10, %11 : vector<128x128xf32>
    %13 = vector.extract_strided_slice %7 {offsets = [0, 1], sizes = [128, 1], strides = [1, 1]} : vector<128x2xf32> to vector<128x1xf32>
    %c1 = arith.constant 1 : index
    %c0_3 = arith.constant 0 : index
    %14 = vector.load %arg2[%c1, %c0_3] : memref<2x128xf32, #tpu.memory_space<vmem>>, vector<1x128xf32>
    %15 = vector.broadcast %13 : vector<128x1xf32> to vector<128x128xf32>
    %16 = vector.broadcast %14 : vector<1x128xf32> to vector<128x128xf32>
    %17 = arith.mulf %15, %16 : vector<128x128xf32>
    %18 = arith.addf %12, %17 : vector<128x128xf32>
    %c0_4 = arith.constant 0 : index
    %c0_5 = arith.constant 0 : index
    %19 = vector.load %arg3[%c0_4, %c0_5] : memref<1x128xf32, #tpu.memory_space<vmem>>, vector<1x128xf32>
    %20 = vector.broadcast %19 : vector<1x128xf32> to vector<128x128xf32>
    %21 = arith.addf %18, %20 : vector<128x128xf32>
    %cst = arith.constant 0.000000e+00 : f32
    %22 = vector.broadcast %cst : f32 to vector<128x128xf32>
    %23 = arith.maximumf %21, %22 : vector<128x128xf32>
    %c0_6 = arith.constant 0 : index
    %c0_7 = arith.constant 0 : index
    %24 = vector.load %arg4[%c0_6, %c0_7] : memref<128x128xf32, #tpu.memory_space<vmem>>, vector<128x128xf32>
    %cst_8 = arith.constant dense<0.000000e+00> : vector<128x128xf32>
    %25 = tpu.matmul %23, %24, %cst_8 {dimension_numbers = #tpu.dot_dimension_numbers<[1], [0], [0], [1], [0, 0, 1, 1], [], []>} : vector<128x128xf32>, vector<128x128xf32>, vector<128x128xf32> -> vector<128x128xf32>
    %c0_9 = arith.constant 0 : index
    %c0_10 = arith.constant 0 : index
    %26 = vector.load %arg5[%c0_9, %c0_10] : memref<1x128xf32, #tpu.memory_space<vmem>>, vector<1x128xf32>
    %27 = vector.broadcast %26 : vector<1x128xf32> to vector<128x128xf32>
    %28 = arith.addf %25, %27 : vector<128x128xf32>
    %cst_11 = arith.constant 0.000000e+00 : f32
    %29 = vector.broadcast %cst_11 : f32 to vector<128x128xf32>
    %30 = arith.maximumf %28, %29 : vector<128x128xf32>
    %c0_12 = arith.constant 0 : index
    %c0_13 = arith.constant 0 : index
    %31 = vector.load %arg6[%c0_12, %c0_13] : memref<128x128xf32, #tpu.memory_space<vmem>>, vector<128x128xf32>
    %cst_14 = arith.constant dense<0.000000e+00> : vector<128x128xf32>
    %32 = tpu.matmul %30, %31, %cst_14 {dimension_numbers = #tpu.dot_dimension_numbers<[1], [0], [0], [1], [0, 0, 1, 1], [], []>} : vector<128x128xf32>, vector<128x128xf32>, vector<128x128xf32> -> vector<128x128xf32>
    %c0_15 = arith.constant 0 : index
    %c0_16 = arith.constant 0 : index
    %33 = vector.load %arg7[%c0_15, %c0_16] : memref<1x128xf32, #tpu.memory_space<vmem>>, vector<1x128xf32>
    %34 = vector.broadcast %33 : vector<1x128xf32> to vector<128x128xf32>
    %35 = arith.addf %32, %34 : vector<128x128xf32>
    %36 = arith.index_cast %5 : i32 to index
    %c0_17 = arith.constant 0 : index
    %37 = vector.load %arg8[%36, %c0_17] : memref<256x128xf32, #tpu.memory_space<vmem>>, vector<128x128xf32>
    tpu.vector_store %arg8[%36, %c0_17], %35 {strides = array<i32>} : memref<256x128xf32, #tpu.memory_space<vmem>>, vector<128x128xf32>,
    %c1_i32 = arith.constant 1 : i32
    %c128_i32_18 = arith.constant 128 : i32
    %38 = arith.muli %c1_i32, %c128_i32_18 : i32
    %39 = arith.addi %0, %38 : i32
    %40 = tpu.assume_multiple %39, 128 : i32
    %c128_i32_19 = arith.constant 128 : i32
    %41 = arith.muli %c1_i32, %c128_i32_19 : i32
    %42 = tpu.assume_multiple %41, 128 : i32
    %43 = arith.index_cast %40 : i32 to index
    %c0_20 = arith.constant 0 : index
    %44 = vector.load %arg1[%43, %c0_20] : memref<512x2xf32, #tpu.memory_space<vmem>>, vector<128x2xf32>
    %45 = vector.extract_strided_slice %44 {offsets = [0, 0], sizes = [128, 1], strides = [1, 1]} : vector<128x2xf32> to vector<128x1xf32>
    %c0_21 = arith.constant 0 : index
    %c0_22 = arith.constant 0 : index
    %46 = vector.load %arg2[%c0_21, %c0_22] : memref<2x128xf32, #tpu.memory_space<vmem>>, vector<1x128xf32>
    %47 = vector.broadcast %45 : vector<128x1xf32> to vector<128x128xf32>
    %48 = vector.broadcast %46 : vector<1x128xf32> to vector<128x128xf32>
    %49 = arith.mulf %47, %48 : vector<128x128xf32>
    %50 = vector.extract_strided_slice %44 {offsets = [0, 1], sizes = [128, 1], strides = [1, 1]} : vector<128x2xf32> to vector<128x1xf32>
    %c1_23 = arith.constant 1 : index
    %c0_24 = arith.constant 0 : index
    %51 = vector.load %arg2[%c1_23, %c0_24] : memref<2x128xf32, #tpu.memory_space<vmem>>, vector<1x128xf32>
    %52 = vector.broadcast %50 : vector<128x1xf32> to vector<128x128xf32>
    %53 = vector.broadcast %51 : vector<1x128xf32> to vector<128x128xf32>
    %54 = arith.mulf %52, %53 : vector<128x128xf32>
    %55 = arith.addf %49, %54 : vector<128x128xf32>
    %c0_25 = arith.constant 0 : index
    %c0_26 = arith.constant 0 : index
    %56 = vector.load %arg3[%c0_25, %c0_26] : memref<1x128xf32, #tpu.memory_space<vmem>>, vector<1x128xf32>
    %57 = vector.broadcast %56 : vector<1x128xf32> to vector<128x128xf32>
    %58 = arith.addf %55, %57 : vector<128x128xf32>
    %cst_27 = arith.constant 0.000000e+00 : f32
    %59 = vector.broadcast %cst_27 : f32 to vector<128x128xf32>
    %60 = arith.maximumf %58, %59 : vector<128x128xf32>
    %c0_28 = arith.constant 0 : index
    %c0_29 = arith.constant 0 : index
    %61 = vector.load %arg4[%c0_28, %c0_29] : memref<128x128xf32, #tpu.memory_space<vmem>>, vector<128x128xf32>
    %cst_30 = arith.constant dense<0.000000e+00> : vector<128x128xf32>
    %62 = tpu.matmul %60, %61, %cst_30 {dimension_numbers = #tpu.dot_dimension_numbers<[1], [0], [0], [1], [0, 0, 1, 1], [], []>} : vector<128x128xf32>, vector<128x128xf32>, vector<128x128xf32> -> vector<128x128xf32>
    %c0_31 = arith.constant 0 : index
    %c0_32 = arith.constant 0 : index
    %63 = vector.load %arg5[%c0_31, %c0_32] : memref<1x128xf32, #tpu.memory_space<vmem>>, vector<1x128xf32>
    %64 = vector.broadcast %63 : vector<1x128xf32> to vector<128x128xf32>
    %65 = arith.addf %62, %64 : vector<128x128xf32>
    %cst_33 = arith.constant 0.000000e+00 : f32
    %66 = vector.broadcast %cst_33 : f32 to vector<128x128xf32>
    %67 = arith.maximumf %65, %66 : vector<128x128xf32>
    %c0_34 = arith.constant 0 : index
    %c0_35 = arith.constant 0 : index
    %68 = vector.load %arg6[%c0_34, %c0_35] : memref<128x128xf32, #tpu.memory_space<vmem>>, vector<128x128xf32>
    %cst_36 = arith.constant dense<0.000000e+00> : vector<128x128xf32>
    %69 = tpu.matmul %67, %68, %cst_36 {dimension_numbers = #tpu.dot_dimension_numbers<[1], [0], [0], [1], [0, 0, 1, 1], [], []>} : vector<128x128xf32>, vector<128x128xf32>, vector<128x128xf32> -> vector<128x128xf32>
    %c0_37 = arith.constant 0 : index
    %c0_38 = arith.constant 0 : index
    %70 = vector.load %arg7[%c0_37, %c0_38] : memref<1x128xf32, #tpu.memory_space<vmem>>, vector<1x128xf32>
    %71 = vector.broadcast %70 : vector<1x128xf32> to vector<128x128xf32>
    %72 = arith.addf %69, %71 : vector<128x128xf32>
    %73 = arith.index_cast %42 : i32 to index
    %c0_39 = arith.constant 0 : index
    %74 = vector.load %arg8[%73, %c0_39] : memref<256x128xf32, #tpu.memory_space<vmem>>, vector<128x128xf32>
    tpu.vector_store %arg8[%73, %c0_39], %72 {strides = array<i32>} : memref<256x128xf32, #tpu.memory_space<vmem>>, vector<128x128xf32>,
    %c2_i32 = arith.constant 2 : i32
    return
  }
  func.func @transform_0(%arg0: i32) -> (i32, i32) {
    %c0_i32 = arith.constant 0 : i32
    %c0_i32_0 = arith.constant 0 : i32
    %c0_i32_1 = arith.constant 0 : i32
    return %c0_i32, %c0_i32_0 : i32, i32
  }
  func.func @transform_1(%arg0: i32) -> (i32, i32) {
    %c0_i32 = arith.constant 0 : i32
    %c0_i32_0 = arith.constant 0 : i32
    %c0_i32_1 = arith.constant 0 : i32
    return %c0_i32, %c0_i32_0 : i32, i32
  }
  func.func @transform_2(%arg0: i32) -> (i32, i32) {
    %c0_i32 = arith.constant 0 : i32
    %c0_i32_0 = arith.constant 0 : i32
    %c0_i32_1 = arith.constant 0 : i32
    return %c0_i32, %c0_i32_0 : i32, i32
  }
  func.func @transform_3(%arg0: i32) -> (i32, i32) {
    %c0_i32 = arith.constant 0 : i32
    %c0_i32_0 = arith.constant 0 : i32
    %c0_i32_1 = arith.constant 0 : i32
    return %c0_i32, %c0_i32_0 : i32, i32
  }
  func.func @transform_4(%arg0: i32) -> (i32, i32) {
    %c0_i32 = arith.constant 0 : i32
    %c0_i32_0 = arith.constant 0 : i32
    %c0_i32_1 = arith.constant 0 : i32
    return %c0_i32, %c0_i32_0 : i32, i32
  }
  func.func @transform_5(%arg0: i32) -> (i32, i32) {
    %c0_i32 = arith.constant 0 : i32
    %c0_i32_0 = arith.constant 0 : i32
    %c0_i32_1 = arith.constant 0 : i32
    return %c0_i32, %c0_i32_0 : i32, i32
  }
  func.func @transform_6(%arg0: i32) -> (i32, i32) {
    %c0_i32 = arith.constant 0 : i32
    %c0_i32_0 = arith.constant 0 : i32
    %c0_i32_1 = arith.constant 0 : i32
    return %c0_i32, %c0_i32_0 : i32, i32
  }
  func.func @transform_7(%arg0: i32) -> (i32, i32) {
    %c0_i32 = arith.constant 0 : i32
    %c0_i32_0 = arith.constant 0 : i32
    return %arg0, %c0_i32 : i32, i32
  }
}

</mosaic_0001>

<bundles_post_ra>
// kernel: dqn_forward.1
= control target key start
LH: loop header
LB: loop body
LE: loop exit
PB: predicated region body
PF: predicated region fallthrough
CT: control target
= control target key end

     0   :  { %s1361_s24 = smov 0   ;;  %s1821_s0 = inlined_call_operand.vmem [shape: f32[512,2], index: 0, kind: input, shape index: {}]   ;;  %s1822_s1 = inlined_call_operand.vmem [shape: f32[2,128], index: 1, kind: input, shape index: {}]   ;;  %s1823_s2 = inlined_call_operand.vmem [shape: f32[1,128], index: 2, kind: input, shape index: {}]   ;;  %s1824_s3 = inlined_call_operand.vmem [shape: f32[128,128], index: 3, kind: input, shape index: {}]   ;;  %s1825_s4 = inlined_call_operand.vmem [shape: f32[1,128], index: 4, kind: input, shape index: {}]   ;;  %s1826_s5 = inlined_call_operand.vmem [shape: f32[128,128], index: 5, kind: input, shape index: {}]   ;;  %s1827_s6 = inlined_call_operand.vmem [shape: f32[1,128], index: 6, kind: input, shape index: {}]   ;;  %s1828_s7 = inlined_call_operand.vmem [shape: f32[512,128], index: 7, kind: output, shape index: {}]  }
   0x1 LB: > { %s1214_s25 = sadd.s32 4294967295, %s1317_s24   ;;  %p1217_p0 = scmp.ge.s32.totalorder %s1317_s24, 1  ;;  %s1317_s24 = sphi %s1361_s24, %s17_s24  }
   0x2   : > { %p227_p1 = scmp.lt.s32.totalorder %s1317_s24, 3 }
   0x4   : > { %p228_p2 = pnand %p1217_p0, %p227_p1 }
   0x5   : > { %s1220_s26 = sshll.u32 (!%p228_p2), %s1214_s25, 8  ;;  %s1218_s27 = sshll.u32 (!%p228_p2), %s1214_s25, 5 }
   0x6   : > { %231 = sbr.rel (%p228_p2) target bundleno = 608 (0x260), region = 48  ;;  %s1376_s29 = scalar_lea.vmem (!%p228_p2), %s1821_s0, %s1220_s26 }
   0x7   : > { %p255_p3 = scmp.lt.s32.totalorder (!%p228_p2), %s1218_s27, 63 }
   0xb   : > { %v1319_v0 = vmov 0   ;;  %v1223_v1 = vld [vmem:[%s1376_s29 + $0x88] sm:$0xff]  ;;  %v1222_v2 = vld [vmem:[%s1376_s29 + $0x80] sm:$0xff]  ;;  %v1320_v4 = vmov 1   ;;  %v264_v5 = vld [vmem:[%s1376_s29 + $0x10] sm:$0xff]  ;;  %s1830_s27 = smov (!%p255_p3, %s1218_s27), 63 }
   0xc   : > { %1268 = vset.pattern.permute.xlu1 %v1319_v0  ;;  %1266 = vset.pattern.permute.xlu0 %v1319_v0  ;;  %v262_v3 = vld [vmem:[%s1376_s29] sm:$0xff]  ;;  %v1224_v6 = vld [vmem:[%s1376_s29 + $0x90] sm:$0xff]  ;;  %v263_v7 = vld [vmem:[%s1376_s29 + $0x8] sm:$0xff]  ;;  %s1219_s28 = sshll.u32 %s1830_s27, 3 }
   0xd   : > { %1270 = vset.pattern.permute.xlu2 %v1319_v0  ;;  %738 = vperm.xlu1 %1268, %v1223_v1   ;;  %v1225_v8 = vld [vmem:[%s1376_s29 + $0x98] sm:$0xff]  ;;  %v1227_v9 = vld [vmem:[%s1376_s29 + $0xa8] sm:$0xff]  ;;  %v1395_v10 = vld [vmem:[%s1376_s29 + $0x30] sm:$0xff]  ;;  %s1732_s25 = scalar_lea.vmem %s1828_s7, %s1219_s28 }
   0xe   : > { %733 = vperm.xlu0 %1266, %v1222_v2   ;;  %281 = vperm.xlu2 %1270, %v262_v3   ;;  %v1226_v11 = vld [vmem:[%s1376_s29 + $0xa0] sm:$0xff]  ;;  %v1228_v12 = vld [vmem:[%s1376_s29 + $0xb0] sm:$0xff]  ;;  %v265_v13 = vld [vmem:[%s1376_s29 + $0x18] sm:$0xff] }
   0xf   : > { %v266_v14 = vld [vmem:[%s1376_s29 + $0x20] sm:$0xff]  ;;  %v525_v15 = vld [vmem:[%s1824_s3 + $0x78] sm:$0xff]  ;;  %v524_v16 = vld [vmem:[%s1824_s3 + $0x70] sm:$0xff] }
  0x10   : > { %v1414_v17 = vld [vmem:[%s1376_s29 + $0x38] sm:$0xff]  ;;  %530 = vmatpush.msra.mxu0 %v525_v15  ;;  %982 = vmatpush.msra.mxu2 %v525_v15  ;;  %v523_v18 = vld [vmem:[%s1824_s3 + $0x68] sm:$0xff]  ;;  %v522_v19 = vld [vmem:[%s1824_s3 + $0x60] sm:$0xff] }
  0x11   : > { %v521_v20 = vld [vmem:[%s1824_s3 + $0x58] sm:$0xff]  ;;  %v267_v21 = vld [vmem:[%s1376_s29 + $0x28] sm:$0xff]  ;;  %v520_v22 = vld [vmem:[%s1824_s3 + $0x50] sm:$0xff] }
  0x12   : > { %531 = vmatpush.msra.mxu0 %v524_v16  ;;  %983 = vmatpush.msra.mxu2 %v524_v16  ;;  %v519_v23 = vld [vmem:[%s1824_s3 + $0x48] sm:$0xff]  ;;  %v518_v24 = vld [vmem:[%s1824_s3 + $0x40] sm:$0xff]  ;;  %v1229_v25 = vld [vmem:[%s1376_s29 + $0xb8] sm:$0xff] }
  0x13   : > { %v517_v26 = vld [vmem:[%s1824_s3 + $0x38] sm:$0xff]  ;;  %v516_v27 = vld [vmem:[%s1824_s3 + $0x30] sm:$0xff]  ;;  %v515_v29 = vld [vmem:[%s1824_s3 + $0x28] sm:$0xff] }
  0x14   : > { %532 = vmatpush.msra.mxu0 %v523_v18  ;;  %984 = vmatpush.msra.mxu2 %v523_v18  ;;  %v1446_v28 = vld [vmem:[%s1376_s29 + $0xd8] sm:$0xff]  ;;  %v514_v30 = vld [vmem:[%s1824_s3 + $0x20] sm:$0xff]  ;;  %v512_v33 = vld [vmem:[%s1824_s3 + $0x10] sm:$0xff] }
  0x15   : > { %1269 = vset.pattern.permute.xlu1 %v1320_v4  ;;  %v513_v32 = vld [vmem:[%s1824_s3 + $0x18] sm:$0xff]  ;;  %v1230_v34 = vld [vmem:[%s1376_s29 + $0xc0] sm:$0xff]  ;;  %v511_v36 = vld [vmem:[%s1824_s3 + $0x8] sm:$0xff] }
  0x16   : > { %1267 = vset.pattern.permute.xlu0 %v1320_v4  ;;  %834 = vperm.xlu1 %1269, %v1223_v1   ;;  %v1469_v35 = vld [vmem:[%s1822_s1] ss:$0 sm:$0xff]  ;;  %v1232_v37 = vld [vmem:[%s1376_s29 + $0xd0] sm:$0xff]  ;;  %v1481_v39 = vld [vmem:[%s1822_s1 + $0x1] ss:$0 sm:$0xff] }
  0x17   : > { %830 = vperm.xlu0 %1267, %v1222_v2   ;;  %1271 = vset.pattern.permute.xlu2 %v1320_v4  ;;  %v510_v38 = vld [vmem:[%s1824_s3] sm:$0xff]  ;;  %v1231_v47 = vld [vmem:[%s1376_s29 + $0xc8] sm:$0xff]  ;;  %v1518_v2 = vld [vmem:[%s1376_s29 + $0x58] sm:$0xff] }
  0x18   : > { %378 = vperm.xlu2 %1271, %v262_v3   ;;  %533 = vmatpush.msra.mxu0 %v522_v19  ;;  %v1488_v43 = vld [vmem:[%s1823_s2] ss:$0 sm:$0xff]  ;;  %v1504_v54 = vld [vmem:[%s1822_s1 + $0x1] ss:$0 sm:$0xff]  ;;  %v271_v3 = vld [vmem:[%s1376_s29 + $0x48] sm:$0xff] }
  0x19   : > { %985 = vmatpush.msra.mxu2 %v522_v19  ;;  %v270_v51 = vld [vmem:[%s1376_s29 + $0x40] sm:$0xff] }
  0x1a   : > { %534 = vmatpush.msra.mxu0 %v521_v20  ;;  %v1499_v53 = vld [vmem:[%s1822_s1] ss:$0 sm:$0xff] }
  0x1b   : > { %986 = vmatpush.msra.mxu2 %v521_v20  ;;  %v1511_v59 = vld [vmem:[%s1823_s2] ss:$0 sm:$0xff] }
  0x1c   : > { %535 = vmatpush.msra.mxu0 %v520_v22 }
  0x1d   : > { %987 = vmatpush.msra.mxu2 %v520_v22 }
  0x1e   : > { %1272 = vset.pattern.permute.xlu1 %v1319_v0  ;;  %536 = vmatpush.msra.mxu0 %v519_v23 }
  0x1f   : > { %386 = vperm.xlu0 %1267, %v264_v5   ;;  %743 = vperm.xlu1 %1272, %v1224_v6  }
  0x20   : > { %838 = vperm.xlu2 %1271, %v1224_v6   ;;  %988 = vmatpush.msra.mxu2 %v519_v23  ;;  %v272_v23 = vld [vmem:[%s1376_s29 + $0x50] sm:$0xff] }
  0x21   : > { %537 = vmatpush.msra.mxu0 %v518_v24 }
  0x22   : > { %989 = vmatpush.msra.mxu2 %v518_v24 }
  0x23   : > { %538 = vmatpush.msra.mxu0 %v517_v26 }
  0x24   : > { %990 = vmatpush.msra.mxu2 %v517_v26 }
  0x25   : > { %539 = vmatpush.msra.mxu0 %v516_v27 }
  0x26   : > { %991 = vmatpush.msra.mxu2 %v516_v27 }
  0x27   : > { %1275 = vset.pattern.permute.xlu0 %v1319_v0  ;;  %1273 = vset.pattern.permute.xlu1 %v1320_v4 }
  0x28   : > { %286 = vperm.xlu0 %1275, %v263_v7   ;;  %382 = vperm.xlu1 %1273, %v263_v7  }
  0x29   : > { %1274 = vset.pattern.permute.xlu2 %v1319_v0  ;;  %540 = vmatpush.msra.mxu0 %v515_v29 }
  0x2a   : > { %748 = vperm.xlu2 %1274, %v1225_v8   ;;  %992 = vmatpush.msra.mxu2 %v515_v29 }
  0x2b   : > { %541 = vmatpush.msra.mxu0 %v514_v30 }
  0x2c   : > { %993 = vmatpush.msra.mxu2 %v514_v30 }
  0x2d   : > { %542 = vmatpush.msra.mxu0 %v513_v32 }
  0x2e   : > { %994 = vmatpush.msra.mxu2 %v513_v32 }
  0x2f   : > { %543 = vmatpush.msra.mxu0 %v512_v33 }
  0x30   : > { %758 = vperm.xlu0 %1275, %v1227_v9   ;;  %842 = vperm.xlu1 %1273, %v1225_v8  }
  0x31   : > { %995 = vmatpush.msra.mxu2 %v512_v33  ;;  %544 = vmatpush.msra.mxu0 %v511_v36 }
  0x32   : > { %291 = vperm.xlu2 %1274, %v264_v5  }
  0x33   : > { %996 = vmatpush.msra.mxu2 %v511_v36  ;;  %545 = vmatpush.msra.mxu0 %v510_v38 }
  0x35   : > { %997 = vmatpush.msra.mxu2 %v510_v38 }
  0x38   : > { %311 = vperm.xlu0 %1275, %v1395_v10   ;;  %1276 = vset.pattern.permute.xlu1 %v1319_v0 }
  0x39   : > { %753 = vperm.xlu1 %1276, %v1226_v11  }
  0x3a   : > { %1277 = vset.pattern.permute.xlu2 %v1320_v4 }
  0x3b   : > { %846 = vperm.xlu2 %1277, %v1226_v11  }
  0x40   : > { %1282 = vset.pattern.permute.xlu0 %v1320_v4 }
  0x41   : > { %854 = vperm.xlu0 %1282, %v1228_v12   ;;  %296 = vperm.xlu1 %1276, %v265_v13  }
  0x43   : > { %390 = vperm.xlu2 %1277, %v265_v13   ;;  %v1527_v13 = vld [vmem:[%s1376_s29 + $0x60] sm:$0xff] }
  0x49   : > { %1278 = vset.pattern.permute.xlu1 %v1320_v4  ;;  %406 = vperm.xlu0 %1282, %v1414_v17  }
  0x4a   : > { %850 = vperm.xlu1 %1278, %v1227_v9  }
  0x4b   : > { %1279 = vset.pattern.permute.xlu2 %v1319_v0 }
  0x4c   : > { %301 = vperm.xlu2 %1279, %v266_v14  }
  0x51   : > { %874 = vperm.xlu0 %1282, %v1446_v28  }
  0x52   : > { %394 = vperm.xlu1 %1278, %v266_v14  }
  0x54   : > { %763 = vperm.xlu2 %1279, %v1228_v12  }
  0x59   : > { %1289 = vset.pattern.permute.xlu0 %v1319_v0 }
  0x5a   : > { %1280 = vset.pattern.permute.xlu1 %v1319_v0  ;;  %783 = vperm.xlu0 %1289, %v1232_v37  }
  0x5b   : > { %306 = vperm.xlu1 %1280, %v267_v21  }
  0x5c   : > { %1281 = vset.pattern.permute.xlu2 %v1320_v4 }
  0x5d   : > { %398 = vperm.xlu2 %1281, %v267_v21  }
  0x62   : > { %336 = vperm.xlu0 %1289, %v1518_v2  }
  0x63   : > { %768 = vperm.xlu1 %1280, %v1229_v25  }
  0x65   : > { %858 = vperm.xlu2 %1281, %v1229_v25  }
  0x68   : > { %v282_v31 = vpop.permute.xlu2 %281 }
  0x69   : > { %v360_v40 = vmul.f32 %v1469_v35, %v282_v31 }
  0x6a   : > { %1294 = vset.pattern.permute.xlu0 %v1320_v4 }
  0x6b   : > { %1283 = vset.pattern.permute.xlu1 %v1320_v4  ;;  %426 = vperm.xlu0 %1294, %v1527_v13  }
  0x6c   : > { %402 = vperm.xlu1 %1283, %v1395_v10  }
  0x6d   : > { %1284 = vset.pattern.permute.xlu2 %v1319_v0 }
  0x6e   : > { %773 = vperm.xlu2 %1284, %v1230_v34  }
  0x72   : > { %v379_v41 = vpop.permute.xlu2 %378 }
  0x73   : > { %v442_v42 = vmul.f32 %v1481_v39, %v379_v41  ;;  %1297 = vset.pattern.permute.xlu0 %v1319_v0 }
  0x74   : > { %862 = vperm.xlu1 %1283, %v1230_v34   ;;  %v1234_v34 = vld [vmem:[%s1376_s29 + $0xe0] sm:$0xff] }
  0x75   : > { %v458_v44 = vadd.f32 %v442_v42, %v360_v40 }
  0x76   : > { %316 = vperm.xlu2 %1284, %v1414_v17  }
  0x77   : > { %v478_v45 = vadd.f32 %v1488_v43, %v458_v44 }
  0x79   : > { %v494_v46 = vmax.f32 %v478_v45, 0.0 }
  0x7a   : > { %v839_v48 = vpop.permute.xlu2 %838 }
  0x7b   : > { %546 = vmatmul.f32.vlgmr.msra.gmra.mxu0 %v494_v46  ;;  %v896_v9 = vmul.f32 %v1504_v54, %v839_v48 }
  0x7c   : > { %1285 = vset.pattern.permute.xlu1 %v1319_v0 }
  0x7d   : > { %778 = vperm.xlu1 %1285, %v1231_v47  }
  0x7e   : > { %1286 = vset.pattern.permute.xlu2 %v1320_v4 }
  0x7f   : > { %866 = vperm.xlu2 %1286, %v1231_v47   ;;  %v739_v49 = vpop.permute.xlu1 %738 }
  0x80   : > { %v734_v50 = vpop.permute.xlu0 %733  ;;  %v813_v63 = vmul.f32 %v1499_v53, %v739_v49 }
  0x81   : > { %v812_v55 = vmul.f32 %v1499_v53, %v734_v50  ;;  %v1235_v50 = vld [vmem:[%s1376_s29 + $0xe8] sm:$0xff] }
  0x84   : > { %v749_v52 = vpop.permute.xlu2 %748 }
  0x85   : > { %321 = vperm.xlu1 %1285, %v270_v51   ;;  %v815_v29 = vmul.f32 %v1499_v53, %v749_v52  ;;  %v1237_v52 = vld [vmem:[%s1376_s29 + $0xf8] sm:$0xff] }
  0x86   : > { %808 = vperm.xlu0 %1297, %v1237_v52  }
  0x87   : > { %410 = vperm.xlu2 %1286, %v270_v51  }
  0x88   : > { %v835_v56 = vpop.permute.xlu1 %834 }
  0x89   : > { %v831_v57 = vpop.permute.xlu0 %830  ;;  %v895_v60 = vmul.f32 %v1504_v54, %v835_v56 }
  0x8a   : > { %v894_v58 = vmul.f32 %v1504_v54, %v831_v57 }
  0x8b   : > { %v911_v5 = vadd.f32 %v895_v60, %v813_v63  ;;  %v1561_v63 = vld [vmem:[%s1376_s29 + $0x78] sm:$0xff] }
  0x8c   : > { %v910_v61 = vadd.f32 %v894_v58, %v812_v55  ;;  %v292_v62 = vpop.permute.xlu2 %291 }
  0x8d   : > { %1287 = vset.pattern.permute.xlu1 %v1320_v4  ;;  %v931_v11 = vadd.f32 %v1511_v59, %v911_v5  ;;  %v362_v21 = vmul.f32 %v1469_v35, %v292_v62 }
  0x8e   : > { %v930_v1 = vadd.f32 %v1511_v59, %v910_v61  ;;  %870 = vperm.xlu1 %1287, %v1232_v37   ;;  %1300 = vset.pattern.permute.xlu0 %v1320_v4 }
  0x8f   : > { %1288 = vset.pattern.permute.xlu2 %v1319_v0  ;;  %v947_v15 = vmax.f32 %v931_v11, 0.0  ;;  %438 = vperm.xlu0 %1300, %v1561_v63  }
  0x90   : > { %v946_v6 = vmax.f32 %v930_v1, 0.0  ;;  %326 = vperm.xlu2 %1288, %v271_v3  }
  0x91   : > { %v387_v7 = vpop.permute.xlu0 %386  ;;  %v744_v8 = vpop.permute.xlu1 %743 }
  0x92   : > { %998 = vmatmul.f32.vlgmr.msra.gmra.mxu2 %v946_v6  ;;  %v814_v10 = vmul.f32 %v1499_v53, %v744_v8  ;;  %v444_v19 = vmul.f32 %v1481_v39, %v387_v7 }
  0x94   : > { %v912_v14 = vadd.f32 %v896_v9, %v814_v10  ;;  %v460_v26 = vadd.f32 %v444_v19, %v362_v21  ;;  %v1236_v9 = vld [vmem:[%s1376_s29 + $0xf0] sm:$0xff]  ;;  %v275_v19 = vld [vmem:[%s1376_s29 + $0x68] sm:$0xff] }
  0x95   : > { %v847_v12 = vpop.permute.xlu2 %846 }
  0x96   : > { %414 = vperm.xlu1 %1287, %v271_v3   ;;  %v932_v22 = vadd.f32 %v1511_v59, %v912_v14  ;;  %v480_v33 = vadd.f32 %v1488_v43, %v460_v26  ;;  %v898_v44 = vmul.f32 %v1504_v54, %v847_v12 }
  0x98   : > { %788 = vperm.xlu2 %1288, %v1446_v28   ;;  %v948_v27 = vmax.f32 %v932_v22, 0.0  ;;  %v496_v40 = vmax.f32 %v480_v33, 0.0  ;;  %v625_v33 = vld [vmem:[%s1826_s5 + $0x70] sm:$0xff] }
  0x9a   : > { %1001 = vmatmul.f32.gmra.mxu2 %v947_v15  ;;  %v287_v16 = vpop.permute.xlu0 %286  ;;  %v383_v18 = vpop.permute.xlu1 %382 }
  0x9b   : > { %v361_v17 = vmul.f32 %v1469_v35, %v287_v16  ;;  %v443_v20 = vmul.f32 %v1481_v39, %v383_v18 }
  0x9d   : > { %v391_v24 = vpop.permute.xlu2 %390  ;;  %v459_v25 = vadd.f32 %v443_v20, %v361_v17 }
  0x9e   : > { %1290 = vset.pattern.permute.xlu1 %v1319_v0  ;;  %v445_v55 = vmul.f32 %v1481_v39, %v391_v24 }
  0x9f   : > { %331 = vperm.xlu1 %1290, %v272_v23   ;;  %v479_v28 = vadd.f32 %v1488_v43, %v459_v25 }
  0xa0   : > { %1291 = vset.pattern.permute.xlu2 %v1320_v4 }
  0xa1   : > { %418 = vperm.xlu2 %1291, %v272_v23   ;;  %v495_v30 = vmax.f32 %v479_v28, 0.0 }
  0xa2   : > { %1004 = vmatmul.f32.gmra.mxu2 %v948_v27  ;;  %v843_v31 = vpop.permute.xlu1 %842  ;;  %v759_v38 = vpop.permute.xlu0 %758 }
  0xa3   : > { %v897_v32 = vmul.f32 %v1504_v54, %v843_v31  ;;  %549 = vmatmul.f32.gmra.mxu0 %v495_v30  ;;  %v817_v3 = vmul.f32 %v1499_v53, %v759_v38  ;;  %v276_v30 = vld [vmem:[%s1376_s29 + $0x70] sm:$0xff] }
  0xa5   : > { %v913_v36 = vadd.f32 %v897_v32, %v815_v29  ;;  %v626_v32 = vld [vmem:[%s1826_s5 + $0x78] sm:$0xff] }
  0xa6   : > { %v302_v37 = vpop.permute.xlu2 %301  ;;  %631 = vmatpush.msra.mxu1 %v626_v32  ;;  %1083 = vmatpush.msra.mxu3 %v626_v32 }
  0xa7   : > { %793 = vperm.xlu1 %1290, %v1234_v34   ;;  %v933_v41 = vadd.f32 %v1511_v59, %v913_v36  ;;  %v364_v14 = vmul.f32 %v1469_v35, %v302_v37 }
  0xa8   : > { %632 = vmatpush.msra.mxu1 %v625_v33  ;;  %1084 = vmatpush.msra.mxu3 %v625_v33 }
  0xa9   : > { %878 = vperm.xlu2 %1291, %v1234_v34   ;;  %v949_v42 = vmax.f32 %v933_v41, 0.0 }
  0xaa   : > { %v1553_v51 = vpop.permute.xlu0 %311 }
  0xab   : > { %v754_v45 = vpop.permute.xlu1 %753  ;;  %552 = vmatmul.f32.gmra.mxu0 %v496_v40  ;;  %1007 = vmatmul.f32.gmra.mxu2 %v949_v42  ;;  %v623_v40 = vld [vmem:[%s1826_s5 + $0x60] sm:$0xff]  ;;  %v622_v42 = vld [vmem:[%s1826_s5 + $0x58] sm:$0xff] }
  0xac   : > { %v816_v46 = vmul.f32 %v1499_v53, %v754_v45 }
  0xae   : > { %v764_v47 = vpop.permute.xlu2 %763  ;;  %v914_v48 = vadd.f32 %v898_v44, %v816_v46  ;;  %v621_v44 = vld [vmem:[%s1826_s5 + $0x50] sm:$0xff] }
  0xaf   : > { %1292 = vset.pattern.permute.xlu1 %v1320_v4  ;;  %v818_v7 = vmul.f32 %v1499_v53, %v764_v47 }
  0xb0   : > { %422 = vperm.xlu1 %1292, %v1518_v2   ;;  %v934_v49 = vadd.f32 %v1511_v59, %v914_v48  ;;  %v366_v48 = vmul.f32 %v1469_v35, %v1553_v51  ;;  %v619_v51 = vld [vmem:[%s1826_s5 + $0x40] sm:$0xff] }
  0xb1   : > { %1293 = vset.pattern.permute.xlu2 %v1319_v0 }
  0xb2   : > { %798 = vperm.xlu2 %1293, %v1235_v50   ;;  %v950_v56 = vmax.f32 %v934_v49, 0.0  ;;  %v620_v49 = vld [vmem:[%s1826_s5 + $0x48] sm:$0xff] }
  0xb3   : > { %v297_v57 = vpop.permute.xlu1 %296  ;;  %v855_v2 = vpop.permute.xlu0 %854 }
  0xb4   : > { %v363_v58 = vmul.f32 %v1469_v35, %v297_v57  ;;  %1010 = vmatmul.f32.gmra.mxu2 %v950_v56  ;;  %v900_v8 = vmul.f32 %v1504_v54, %v855_v2  ;;  %v616_v2 = vld [vmem:[%s1826_s5 + $0x28] sm:$0xff] }
  0xb6   : > { %v461_v60 = vadd.f32 %v445_v55, %v363_v58  ;;  %v916_v12 = vadd.f32 %v900_v8, %v818_v7 }
  0xb7   : > { %v399_v61 = vpop.permute.xlu2 %398 }
  0xb8   : > { %882 = vperm.xlu1 %1292, %v1235_v50   ;;  %v481_v62 = vadd.f32 %v1488_v43, %v461_v60  ;;  %v936_v18 = vadd.f32 %v1511_v59, %v916_v12  ;;  %v447_v25 = vmul.f32 %v1481_v39, %v399_v61  ;;  %v618_v61 = vld [vmem:[%s1826_s5 + $0x38] sm:$0xff] }
  0xb9   : > { %v614_v12 = vld [vmem:[%s1826_s5 + $0x18] sm:$0xff] }
  0xba   : > { %341 = vperm.xlu2 %1293, %v1527_v13   ;;  %v497_v1 = vmax.f32 %v481_v62, 0.0  ;;  %v952_v23 = vmax.f32 %v936_v18, 0.0  ;;  %v617_v62 = vld [vmem:[%s1826_s5 + $0x30] sm:$0xff] }
  0xbb   : > { %v407_v46 = vpop.permute.xlu0 %406 }
  0xbc   : > { %v851_v5 = vpop.permute.xlu1 %850  ;;  %555 = vmatmul.f32.gmra.mxu0 %v497_v1  ;;  %v449_v56 = vmul.f32 %v1481_v39, %v407_v46 }
  0xbd   : > { %v899_v6 = vmul.f32 %v1504_v54, %v851_v5 }
  0xbf   : > { %v859_v10 = vpop.permute.xlu2 %858  ;;  %v915_v11 = vadd.f32 %v899_v6, %v817_v3 }
  0xc0   : > { %1295 = vset.pattern.permute.xlu1 %v1319_v0  ;;  %v901_v34 = vmul.f32 %v1504_v54, %v859_v10 }
  0xc1   : > { %803 = vperm.xlu1 %1295, %v1236_v9   ;;  %v935_v13 = vadd.f32 %v1511_v59, %v915_v11 }
  0xc2   : > { %1296 = vset.pattern.permute.xlu2 %v1320_v4 }
  0xc3   : > { %886 = vperm.xlu2 %1296, %v1236_v9   ;;  %v951_v15 = vmax.f32 %v935_v13, 0.0  ;;  %v615_v9 = vld [vmem:[%s1826_s5 + $0x20] sm:$0xff]  ;;  %v613_v13 = vld [vmem:[%s1826_s5 + $0x10] sm:$0xff] }
  0xc4   : > { %v395_v16 = vpop.permute.xlu1 %394 }
  0xc5   : > { %v446_v17 = vmul.f32 %v1481_v39, %v395_v16  ;;  %1013 = vmatmul.f32.gmra.mxu2 %v951_v15  ;;  %v612_v15 = vld [vmem:[%s1826_s5 + $0x8] sm:$0xff] }
  0xc7   : > { %v462_v20 = vadd.f32 %v446_v17, %v364_v14 }
  0xc8   : > { %v1578_v21 = vpop.permute.xlu2 %773 }
  0xc9   : > { %346 = vperm.xlu1 %1295, %v275_v19   ;;  %v482_v22 = vadd.f32 %v1488_v43, %v462_v20  ;;  %v611_v20 = vld [vmem:[%s1826_s5] sm:$0xff] }
  0xcb   : > { %430 = vperm.xlu2 %1296, %v275_v19   ;;  %v498_v24 = vmax.f32 %v482_v22, 0.0  ;;  %v875_v22 = vpop.permute.xlu0 %874 }
  0xcd   : > { %v307_v26 = vpop.permute.xlu1 %306  ;;  %558 = vmatmul.f32.gmra.mxu0 %v498_v24  ;;  %1016 = vmatmul.f32.gmra.mxu2 %v952_v23  ;;  %v1656_v24 = vld [vmem:[%s1825_s4] ss:$0 sm:$0xff] }
  0xce   : > { %v365_v27 = vmul.f32 %v1469_v35, %v307_v26 }
  0xd0   : > { %v463_v28 = vadd.f32 %v447_v25, %v365_v27  ;;  %v317_v31 = vpop.permute.xlu2 %316 }
  0xd1   : > { %1298 = vset.pattern.permute.xlu1 %v1320_v4  ;;  %v367_v55 = vmul.f32 %v1469_v35, %v317_v31 }
  0xd2   : > { %890 = vperm.xlu1 %1298, %v1237_v52   ;;  %v483_v29 = vadd.f32 %v1488_v43, %v463_v28 }
  0xd3   : > { %1299 = vset.pattern.permute.xlu2 %v1319_v0  ;;  %v624_v0 = vld [vmem:[%s1826_s5 + $0x68] sm:$0xff]  ;;  %v465_v58 = vadd.f32 %v449_v56, %v367_v55 }
  0xd4   : > { %351 = vperm.xlu2 %1299, %v276_v30   ;;  %v499_v4 = vmax.f32 %v483_v29, 0.0  ;;  %633 = vmatpush.msra.mxu1 %v624_v0 }
  0xd5   : > { %v769_v36 = vpop.permute.xlu1 %768  ;;  %1085 = vmatpush.msra.mxu3 %v624_v0  ;;  %v485_v7 = vadd.f32 %v1488_v43, %v465_v58 }
  0xd6   : > { %v819_v37 = vmul.f32 %v1499_v53, %v769_v36  ;;  %561 = vmatmul.f32.gmra.mxu0 %v499_v4  ;;  %634 = vmatpush.msra.mxu1 %v623_v40 }
  0xd7   : > { %1086 = vmatpush.msra.mxu3 %v623_v40  ;;  %v501_v10 = vmax.f32 %v485_v7, 0.0 }
  0xd8   : > { %v917_v38 = vadd.f32 %v901_v34, %v819_v37  ;;  %635 = vmatpush.msra.mxu1 %v622_v42  ;;  %v784_v34 = vpop.permute.xlu0 %783 }
  0xd9   : > { %v867_v47 = vpop.permute.xlu2 %866  ;;  %1087 = vmatpush.msra.mxu3 %v622_v42  ;;  %v822_v37 = vmul.f32 %v1499_v53, %v784_v34 }
  0xda   : > { %434 = vperm.xlu1 %1298, %v276_v30   ;;  %v937_v41 = vadd.f32 %v1511_v59, %v917_v38  ;;  %636 = vmatpush.msra.mxu1 %v621_v44  ;;  %v903_v16 = vmul.f32 %v1504_v54, %v867_v47 }
  0xdb   : > { %1088 = vmatpush.msra.mxu3 %v621_v44 }
  0xdc   : > { %356 = vperm.xlu2 %1299, %v1561_v63   ;;  %v953_v45 = vmax.f32 %v937_v41, 0.0  ;;  %637 = vmatpush.msra.mxu1 %v620_v49  ;;  %v820_v63 = vmul.f32 %v1499_v53, %v1578_v21  ;;  %v905_v41 = vmul.f32 %v1504_v54, %v875_v22 }
  0xdd   : > { %1089 = vmatpush.msra.mxu3 %v620_v49 }
  0xde   : > { %v403_v50 = vpop.permute.xlu1 %402  ;;  %1019 = vmatmul.f32.gmra.mxu2 %v953_v45  ;;  %638 = vmatpush.msra.mxu1 %v619_v51 }
  0xdf   : > { %v448_v52 = vmul.f32 %v1481_v39, %v403_v50  ;;  %1090 = vmatpush.msra.mxu3 %v619_v51 }
  0xe0   : > { %639 = vmatpush.msra.mxu1 %v618_v61 }
  0xe1   : > { %v464_v57 = vadd.f32 %v448_v52, %v366_v48  ;;  %1091 = vmatpush.msra.mxu3 %v618_v61  ;;  %v411_v5 = vpop.permute.xlu2 %410 }
  0xe2   : > { %640 = vmatpush.msra.mxu1 %v617_v62  ;;  %v450_v25 = vmul.f32 %v1481_v39, %v411_v5 }
  0xe3   : > { %v484_v60 = vadd.f32 %v1488_v43, %v464_v57  ;;  %1092 = vmatpush.msra.mxu3 %v617_v62  ;;  %v1675_v62 = vld [vmem:[%s1825_s4] ss:$0 sm:$0xff] }
  0xe4   : > { %641 = vmatpush.msra.mxu1 %v616_v2 }
  0xe5   : > { %v500_v1 = vmax.f32 %v484_v60, 0.0  ;;  %1093 = vmatpush.msra.mxu3 %v616_v2 }
  0xe6   : > { %v863_v3 = vpop.permute.xlu1 %862  ;;  %642 = vmatpush.msra.mxu1 %v615_v9 }
  0xe7   : > { %v902_v6 = vmul.f32 %v1504_v54, %v863_v3  ;;  %564 = vmatmul.f32.gmra.mxu0 %v500_v1  ;;  %1094 = vmatpush.msra.mxu3 %v615_v9 }
  0xe8   : > { %643 = vmatpush.msra.mxu1 %v614_v12 }
  0xe9   : > { %v918_v8 = vadd.f32 %v902_v6, %v820_v63  ;;  %1095 = vmatpush.msra.mxu3 %v614_v12 }
  0xea   : > { %644 = vmatpush.msra.mxu1 %v613_v13  ;;  %v327_v19 = vpop.permute.xlu2 %326 }
  0xeb   : > { %v938_v11 = vadd.f32 %v1511_v59, %v918_v8  ;;  %1096 = vmatpush.msra.mxu3 %v613_v13  ;;  %v369_v46 = vmul.f32 %v1469_v35, %v327_v19  ;;  %v337_v8 = vpop.permute.xlu0 %336 }
  0xec   : > { %645 = vmatpush.msra.mxu1 %v612_v15 }
  0xed   : > { %v954_v14 = vmax.f32 %v938_v11, 0.0  ;;  %1097 = vmatpush.msra.mxu3 %v612_v15 }
  0xee   : > { %646 = vmatpush.msra.mxu1 %v611_v20 }
  0xef   : > { %v779_v17 = vpop.permute.xlu1 %778  ;;  %567 = vmatmul.f32.gmra.mxu0 %v501_v10  ;;  %1022 = vmatmul.f32.gmra.mxu2 %v954_v14 }
  0xf0   : > { %v821_v18 = vmul.f32 %v1499_v53, %v779_v17  ;;  %1098 = vmatpush.msra.mxu3 %v611_v20 }
  0xf2   : > { %v919_v21 = vadd.f32 %v903_v16, %v821_v18  ;;  %v789_v32 = vpop.permute.xlu2 %788 }
  0xf3   : > { %v823_v44 = vmul.f32 %v1499_v53, %v789_v32  ;;  %v427_v18 = vpop.permute.xlu0 %426 }
  0xf4   : > { %v939_v23 = vadd.f32 %v1511_v59, %v919_v21 }
  0xf5   : > { %v921_v47 = vadd.f32 %v905_v41, %v823_v44 }
  0xf6   : > { %v955_v26 = vmax.f32 %v939_v23, 0.0  ;;  %v371_v23 = vmul.f32 %v1469_v35, %v337_v8 }
  0xf7   : > { %v322_v27 = vpop.permute.xlu1 %321  ;;  %v941_v55 = vadd.f32 %v1511_v59, %v921_v47 }
  0xf8   : > { %v368_v28 = vmul.f32 %v1469_v35, %v322_v27  ;;  %1025 = vmatmul.f32.gmra.mxu2 %v955_v26  ;;  %v547_v29 = vpop.f32.mrf.mxu0 }
  0xf9   : > { %v548_v30 = vadd.f32 %v1656_v24, %v547_v29  ;;  %v957_v58 = vmax.f32 %v941_v55, 0.0 }
  0xfa   : > { %v466_v31 = vadd.f32 %v450_v25, %v368_v28  ;;  %v454_v28 = vmul.f32 %v1481_v39, %v427_v18 }
  0xfb   : > { %v595_v33 = vmax.f32 %v548_v30, 0.0  ;;  %v419_v40 = vpop.permute.xlu2 %418 }
  0xfc   : > { %v486_v4 = vadd.f32 %v1488_v43, %v466_v31  ;;  %v452_v60 = vmul.f32 %v1481_v39, %v419_v40 }
  0xfd   : > { %647 = vmatmul.f32.vlgmr.msra.gmra.mxu1 %v595_v33 }
  0xfe   : > { %v502_v36 = vmax.f32 %v486_v4, 0.0 }
 0x100   : > { %v871_v0 = vpop.permute.xlu1 %870  ;;  %570 = vmatmul.f32.gmra.mxu0 %v502_v36 }
 0x101   : > { %v904_v38 = vmul.f32 %v1504_v54, %v871_v0 }
 0x103   : > { %v920_v42 = vadd.f32 %v904_v38, %v822_v37  ;;  %v879_v56 = vpop.permute.xlu2 %878 }
 0x104   : > { %v906_v9 = vmul.f32 %v1504_v54, %v879_v56 }
 0x105   : > { %v940_v45 = vadd.f32 %v1511_v59, %v920_v42 }
 0x107   : > { %v956_v48 = vmax.f32 %v940_v45, 0.0 }
 0x108   : > { %v415_v49 = vpop.permute.xlu1 %414 }
 0x109   : > { %v451_v50 = vmul.f32 %v1481_v39, %v415_v49  ;;  %1028 = vmatmul.f32.gmra.mxu2 %v956_v48 }
 0x10b   : > { %v467_v52 = vadd.f32 %v451_v50, %v369_v46 }
 0x10c   : > { %v799_v6 = vpop.permute.xlu2 %798 }
 0x10d   : > { %v487_v57 = vadd.f32 %v1488_v43, %v467_v52  ;;  %v825_v37 = vmul.f32 %v1499_v53, %v799_v6 }
 0x10f   : > { %v503_v51 = vmax.f32 %v487_v57, 0.0 }
 0x111   : > { %v332_v61 = vpop.permute.xlu1 %331  ;;  %573 = vmatmul.f32.gmra.mxu0 %v503_v51  ;;  %1031 = vmatmul.f32.gmra.mxu2 %v957_v58 }
 0x112   : > { %v370_v63 = vmul.f32 %v1469_v35, %v332_v61 }
 0x114   : > { %v468_v1 = vadd.f32 %v452_v60, %v370_v63  ;;  %v342_v21 = vpop.permute.xlu2 %341 }
 0x115   : > { %v999_v2 = vpop.f32.mrf.mxu2  ;;  %v372_v29 = vmul.f32 %v1469_v35, %v342_v21 }
 0x116   : > { %v1000_v3 = vadd.f32 %v1675_v62, %v999_v2  ;;  %v488_v5 = vadd.f32 %v1488_v43, %v468_v1 }
 0x117   : > { %v470_v34 = vadd.f32 %v454_v28, %v372_v29 }
 0x118   : > { %v1047_v7 = vmax.f32 %v1000_v3, 0.0  ;;  %v504_v10 = vmax.f32 %v488_v5, 0.0 }
 0x119   : > { %v794_v11 = vpop.permute.xlu1 %793  ;;  %v490_v44 = vadd.f32 %v1488_v43, %v470_v34 }
 0x11a   : > { %1099 = vmatmul.f32.vlgmr.msra.gmra.mxu3 %v1047_v7  ;;  %v824_v12 = vmul.f32 %v1499_v53, %v794_v11  ;;  %576 = vmatmul.f32.gmra.mxu0 %v504_v10 }
 0x11b   : > { %v506_v49 = vmax.f32 %v490_v44, 0.0 }
 0x11c   : > { %v922_v13 = vadd.f32 %v906_v9, %v824_v12  ;;  %v809_v12 = vpop.permute.xlu0 %808 }
 0x11d   : > { %v1002_v14 = vpop.f32.mrf.mxu2  ;;  %v887_v46 = vpop.permute.xlu2 %886 }
 0x11e   : > { %v1003_v15 = vadd.f32 %v1675_v62, %v1002_v14  ;;  %v942_v16 = vadd.f32 %v1511_v59, %v922_v13  ;;  %v908_v56 = vmul.f32 %v1504_v54, %v887_v46 }
 0x120   : > { %v1048_v17 = vmax.f32 %v1003_v15, 0.0  ;;  %v550_v19 = vpop.f32.mrf.mxu0  ;;  %v958_v20 = vmax.f32 %v942_v16, 0.0  ;;  %v827_v16 = vmul.f32 %v1499_v53, %v809_v12 }
 0x121   : > { %v551_v22 = vadd.f32 %v1656_v24, %v550_v19 }
 0x122   : > { %1102 = vmatmul.f32.gmra.mxu3 %v1048_v17  ;;  %v423_v25 = vpop.permute.xlu1 %422  ;;  %1034 = vmatmul.f32.gmra.mxu2 %v958_v20 }
 0x123   : > { %v596_v26 = vmax.f32 %v551_v22, 0.0  ;;  %v453_v27 = vmul.f32 %v1481_v39, %v423_v25 }
 0x124   : > { %v439_v28 = vpop.permute.xlu0 %438 }
 0x125   : > { %v1005_v30 = vpop.f32.mrf.mxu2  ;;  %v469_v31 = vadd.f32 %v453_v27, %v371_v23  ;;  %650 = vmatmul.f32.gmra.mxu1 %v596_v26  ;;  %v431_v61 = vpop.permute.xlu2 %430 }
 0x126   : > { %v1006_v32 = vadd.f32 %v1675_v62, %v1005_v30  ;;  %v455_v6 = vmul.f32 %v1481_v39, %v431_v61 }
 0x127   : > { %v489_v4 = vadd.f32 %v1488_v43, %v469_v31 }
 0x128   : > { %v1049_v33 = vmax.f32 %v1006_v32, 0.0  ;;  %v553_v36 = vpop.f32.mrf.mxu0 }
 0x129   : > { %v554_v0 = vadd.f32 %v1656_v24, %v553_v36  ;;  %v505_v38 = vmax.f32 %v489_v4, 0.0 }
 0x12a   : > { %1105 = vmatmul.f32.gmra.mxu3 %v1049_v33  ;;  %v883_v40 = vpop.permute.xlu1 %882 }
 0x12b   : > { %v597_v41 = vmax.f32 %v554_v0, 0.0  ;;  %v907_v42 = vmul.f32 %v1504_v54, %v883_v40  ;;  %579 = vmatmul.f32.gmra.mxu0 %v505_v38 }
 0x12d   : > { %v923_v45 = vadd.f32 %v907_v42, %v825_v37  ;;  %653 = vmatmul.f32.gmra.mxu1 %v597_v41 }
 0x12e   : > { %v1008_v47 = vpop.f32.mrf.mxu2  ;;  %v352_v15 = vpop.permute.xlu2 %351 }
 0x12f   : > { %v1009_v48 = vadd.f32 %v1675_v62, %v1008_v47  ;;  %v943_v50 = vadd.f32 %v1511_v59, %v923_v45  ;;  %v374_v25 = vmul.f32 %v1469_v35, %v352_v15 }
 0x131   : > { %v1050_v52 = vmax.f32 %v1009_v48, 0.0  ;;  %v959_v55 = vmax.f32 %v943_v50, 0.0 }
 0x133   : > { %v804_v57 = vpop.permute.xlu1 %803  ;;  %582 = vmatmul.f32.gmra.mxu0 %v506_v49  ;;  %1037 = vmatmul.f32.gmra.mxu2 %v959_v55 }
 0x134   : > { %v826_v51 = vmul.f32 %v1499_v53, %v804_v57  ;;  %1108 = vmatmul.f32.gmra.mxu3 %v1050_v52 }
 0x136   : > { %v924_v58 = vadd.f32 %v908_v56, %v826_v51  ;;  %v357_v53 = vpop.permute.xlu2 %356  ;;  %v1727_v51 = vld [vmem:[%s1827_s6] ss:$0 sm:$0xff] }
 0x137   : > { %v1011_v60 = vpop.f32.mrf.mxu2 }
 0x138   : > { %v1012_v63 = vadd.f32 %v1675_v62, %v1011_v60  ;;  %v944_v1 = vadd.f32 %v1511_v59, %v924_v58 }
 0x139   : > { %v556_v2 = vpop.f32.mrf.mxu0 }
 0x13a   : > { %v1051_v3 = vmax.f32 %v1012_v63, 0.0  ;;  %v557_v5 = vadd.f32 %v1656_v24, %v556_v2  ;;  %v960_v7 = vmax.f32 %v944_v1, 0.0 }
 0x13b   : > { %v347_v8 = vpop.permute.xlu1 %346 }
 0x13c   : > { %v598_v9 = vmax.f32 %v557_v5, 0.0  ;;  %v373_v10 = vmul.f32 %v1469_v35, %v347_v8  ;;  %1040 = vmatmul.f32.gmra.mxu2 %v960_v7  ;;  %1111 = vmatmul.f32.gmra.mxu3 %v1051_v3 }
 0x13e   : > { %v471_v11 = vadd.f32 %v455_v6, %v373_v10  ;;  %656 = vmatmul.f32.gmra.mxu1 %v598_v9 }
 0x140   : > { %v491_v13 = vadd.f32 %v1488_v43, %v471_v11 }
 0x142   : > { %v507_v14 = vmax.f32 %v491_v13, 0.0 }
 0x144   : > { %v891_v17 = vpop.permute.xlu1 %890  ;;  %585 = vmatmul.f32.gmra.mxu0 %v507_v14 }
 0x145   : > { %v909_v18 = vmul.f32 %v1504_v54, %v891_v17  ;;  %v457_v54 = vmul.f32 %v1481_v39, %v439_v28 }
 0x147   : > { %v925_v19 = vadd.f32 %v909_v18, %v827_v16  ;;  %v1745_v18 = vld [vmem:[%s1827_s6] ss:$0 sm:$0xff] }
 0x148   : > { %v1014_v20 = vpop.f32.mrf.mxu2 }
 0x149   : > { %v1015_v21 = vadd.f32 %v1675_v62, %v1014_v20  ;;  %v945_v22 = vadd.f32 %v1511_v59, %v925_v19  ;;  %v375_v59 = vmul.f32 %v1469_v35, %v357_v53 }
 0x14a   : > { %v559_v23 = vpop.f32.mrf.mxu0 }
 0x14b   : > { %v1052_v26 = vmax.f32 %v1015_v21, 0.0  ;;  %v560_v27 = vadd.f32 %v1656_v24, %v559_v23  ;;  %v961_v29 = vmax.f32 %v945_v22, 0.0  ;;  %v473_v37 = vadd.f32 %v457_v54, %v375_v59 }
 0x14c   : > { %v435_v30 = vpop.permute.xlu1 %434 }
 0x14d   : > { %v599_v31 = vmax.f32 %v560_v27, 0.0  ;;  %v456_v32 = vmul.f32 %v1481_v39, %v435_v30  ;;  %1043 = vmatmul.f32.gmra.mxu2 %v961_v29  ;;  %1114 = vmatmul.f32.gmra.mxu3 %v1052_v26  ;;  %v493_v39 = vadd.f32 %v1488_v43, %v473_v37 }
 0x14f   : > { %v472_v33 = vadd.f32 %v456_v32, %v374_v25  ;;  %659 = vmatmul.f32.gmra.mxu1 %v599_v31  ;;  %v509_v35 = vmax.f32 %v493_v39, 0.0 }
 0x150   : > { %v1017_v34 = vpop.f32.mrf.mxu2 }
 0x151   : > { %v1018_v4 = vadd.f32 %v1675_v62, %v1017_v34  ;;  %v492_v36 = vadd.f32 %v1488_v43, %v472_v33 }
 0x153   : > { %v1053_v0 = vmax.f32 %v1018_v4, 0.0  ;;  %v562_v38 = vpop.f32.mrf.mxu0  ;;  %v508_v40 = vmax.f32 %v492_v36, 0.0 }
 0x154   : > { %v563_v41 = vadd.f32 %v1656_v24, %v562_v38 }
 0x155   : > { %588 = vmatmul.f32.gmra.mxu0 %v508_v40  ;;  %1117 = vmatmul.f32.gmra.mxu3 %v1053_v0 }
 0x156   : > { %v600_v42 = vmax.f32 %v563_v41, 0.0 }
 0x158   : > { %662 = vmatmul.f32.gmra.mxu1 %v600_v42 }
 0x15d   : > { %591 = vmatmul.f32.gmra.mxu0 %v509_v35 }
 0x161   : > { %v1020_v44 = vpop.f32.mrf.mxu2 }
 0x162   : > { %v1021_v45 = vadd.f32 %v1675_v62, %v1020_v44 }
 0x164   : > { %v1054_v46 = vmax.f32 %v1021_v45, 0.0  ;;  %v565_v47 = vpop.f32.mrf.mxu0 }
 0x165   : > { %v566_v48 = vadd.f32 %v1656_v24, %v565_v47 }
 0x166   : > { %1120 = vmatmul.f32.gmra.mxu3 %v1054_v46 }
 0x167   : > { %v601_v49 = vmax.f32 %v566_v48, 0.0 }
 0x169   : > { %665 = vmatmul.f32.gmra.mxu1 %v601_v49 }
 0x16c   : > { %v568_v50 = vpop.f32.mrf.mxu0 }
 0x16d   : > { %v569_v52 = vadd.f32 %v1656_v24, %v568_v50 }
 0x16f   : > { %v602_v55 = vmax.f32 %v569_v52, 0.0 }
 0x171   : > { %668 = vmatmul.f32.gmra.mxu1 %v602_v55 }
 0x172   : > { %v1023_v43 = vpop.f32.mrf.mxu2 }
 0x173   : > { %v1024_v56 = vadd.f32 %v1675_v62, %v1023_v43 }
 0x175   : > { %v1055_v57 = vmax.f32 %v1024_v56, 0.0 }
 0x177   : > { %1123 = vmatmul.f32.gmra.mxu3 %v1055_v57 }
 0x17a   : > { %v648_v58 = vpop.f32.mrf.mxu1 }
 0x17b   : > { %v1026_v60 = vpop.f32.mrf.mxu2  ;;  %v649_v61 = vadd.f32 %v1727_v51, %v648_v58 }
 0x17c   : > { %v1027_v63 = vadd.f32 %v1675_v62, %v1026_v60 }
 0x17d   : > { %v571_v1 = vpop.f32.mrf.mxu0  ;;  %696 = vst [vmem:[%s1732_s25] sm:$0xff] %v649_v61 }
 0x17e   : > { %v1056_v2 = vmax.f32 %v1027_v63, 0.0  ;;  %v572_v3 = vadd.f32 %v1656_v24, %v571_v1 }
 0x180   : > { %v603_v5 = vmax.f32 %v572_v3, 0.0  ;;  %1126 = vmatmul.f32.gmra.mxu3 %v1056_v2 }
 0x182   : > { %671 = vmatmul.f32.gmra.mxu1 %v603_v5 }
 0x18c   : > { %v1029_v6 = vpop.f32.mrf.mxu2 }
 0x18d   : > { %v1030_v7 = vadd.f32 %v1675_v62, %v1029_v6 }
 0x18e   : > { %v574_v8 = vpop.f32.mrf.mxu0 }
 0x18f   : > { %v1057_v9 = vmax.f32 %v1030_v7, 0.0  ;;  %v575_v10 = vadd.f32 %v1656_v24, %v574_v8 }
 0x191   : > { %v604_v11 = vmax.f32 %v575_v10, 0.0  ;;  %1129 = vmatmul.f32.gmra.mxu3 %v1057_v9 }
 0x193   : > { %674 = vmatmul.f32.gmra.mxu1 %v604_v11 }
 0x194   : > { %v1032_v12 = vpop.f32.mrf.mxu2 }
 0x195   : > { %v1033_v13 = vadd.f32 %v1675_v62, %v1032_v12 }
 0x197   : > { %v1058_v14 = vmax.f32 %v1033_v13, 0.0  ;;  %v577_v15 = vpop.f32.mrf.mxu0 }
 0x198   : > { %v578_v16 = vadd.f32 %v1656_v24, %v577_v15 }
 0x199   : > { %1132 = vmatmul.f32.gmra.mxu3 %v1058_v14 }
 0x19a   : > { %v605_v17 = vmax.f32 %v578_v16, 0.0 }
 0x19c   : > { %677 = vmatmul.f32.gmra.mxu1 %v605_v17 }
 0x19d   : > { %v1100_v19 = vpop.f32.mrf.mxu3 }
 0x19e   : > { %v1101_v20 = vadd.f32 %v1745_v18, %v1100_v19 }
 0x1a0   : > { %1238 = vst [vmem:[%s1732_s25 + $0x80] sm:$0xff] %v1101_v20 }
 0x1a2   : > { %v651_v21 = vpop.f32.mrf.mxu1 }
 0x1a3   : > { %v652_v22 = vadd.f32 %v1727_v51, %v651_v21 }
 0x1a5   : > { %v1103_v23 = vpop.f32.mrf.mxu3  ;;  %697 = vst [vmem:[%s1732_s25 + $0x8] sm:$0xff] %v652_v22  ;;  %v1035_v26 = vpop.f32.mrf.mxu2 }
 0x1a6   : > { %v1104_v25 = vadd.f32 %v1745_v18, %v1103_v23  ;;  %v1036_v27 = vadd.f32 %v1675_v62, %v1035_v26 }
 0x1a8   : > { %1239 = vst [vmem:[%s1732_s25 + $0x88] sm:$0xff] %v1104_v25  ;;  %v1059_v28 = vmax.f32 %v1036_v27, 0.0  ;;  %v580_v29 = vpop.f32.mrf.mxu0 }
 0x1a9   : > { %v581_v30 = vadd.f32 %v1656_v24, %v580_v29 }
 0x1aa   : > { %v654_v53 = vpop.f32.mrf.mxu1  ;;  %1135 = vmatmul.f32.gmra.mxu3 %v1059_v28 }
 0x1ab   : > { %v606_v31 = vmax.f32 %v581_v30, 0.0  ;;  %v655_v32 = vadd.f32 %v1727_v51, %v654_v53 }
 0x1ad   : > { %v1106_v54 = vpop.f32.mrf.mxu3  ;;  %698 = vst [vmem:[%s1732_s25 + $0x10] sm:$0xff] %v655_v32  ;;  %680 = vmatmul.f32.gmra.mxu1 %v606_v31 }
 0x1ae   : > { %v1107_v33 = vadd.f32 %v1745_v18, %v1106_v54 }
 0x1b0   : > { %1240 = vst [vmem:[%s1732_s25 + $0x90] sm:$0xff] %v1107_v33  ;;  %v583_v59 = vpop.f32.mrf.mxu0 }
 0x1b1   : > { %v584_v34 = vadd.f32 %v1656_v24, %v583_v59 }
 0x1b3   : > { %v607_v4 = vmax.f32 %v584_v34, 0.0 }
 0x1b5   : > { %683 = vmatmul.f32.gmra.mxu1 %v607_v4 }
 0x1b6   : > { %v1038_v36 = vpop.f32.mrf.mxu2 }
 0x1b7   : > { %v1039_v37 = vadd.f32 %v1675_v62, %v1038_v36  ;;  %v1109_v0 = vpop.f32.mrf.mxu3 }
 0x1b8   : > { %v1110_v38 = vadd.f32 %v1745_v18, %v1109_v0 }
 0x1b9   : > { %v1060_v40 = vmax.f32 %v1039_v37, 0.0 }
 0x1ba   : > { %1241 = vst [vmem:[%s1732_s25 + $0x98] sm:$0xff] %v1110_v38 }
 0x1bb   : > { %v657_v41 = vpop.f32.mrf.mxu1  ;;  %1138 = vmatmul.f32.gmra.mxu3 %v1060_v40 }
 0x1bc   : > { %v658_v42 = vadd.f32 %v1727_v51, %v657_v41 }
 0x1be   : > { %699 = vst [vmem:[%s1732_s25 + $0x18] sm:$0xff] %v658_v42 }
 0x1bf   : > { %v1041_v39 = vpop.f32.mrf.mxu2  ;;  %v1112_v35 = vpop.f32.mrf.mxu3 }
 0x1c0   : > { %v1042_v44 = vadd.f32 %v1675_v62, %v1041_v39  ;;  %v1113_v45 = vadd.f32 %v1745_v18, %v1112_v35 }
 0x1c1   : > { %v586_v46 = vpop.f32.mrf.mxu0 }
 0x1c2   : > { %v1061_v47 = vmax.f32 %v1042_v44, 0.0  ;;  %1242 = vst [vmem:[%s1732_s25 + $0xa0] sm:$0xff] %v1113_v45  ;;  %v587_v48 = vadd.f32 %v1656_v24, %v586_v46 }
 0x1c4   : > { %v608_v49 = vmax.f32 %v587_v48, 0.0  ;;  %1141 = vmatmul.f32.gmra.mxu3 %v1061_v47 }
 0x1c6   : > { %686 = vmatmul.f32.gmra.mxu1 %v608_v49 }
 0x1cc   : > { %v660_v50 = vpop.f32.mrf.mxu1 }
 0x1cd   : > { %v661_v52 = vadd.f32 %v1727_v51, %v660_v50 }
 0x1cf   : > { %700 = vst [vmem:[%s1732_s25 + $0x20] sm:$0xff] %v661_v52 }
 0x1d0   : > { %v1044_v55 = vpop.f32.mrf.mxu2  ;;  %v1115_v43 = vpop.f32.mrf.mxu3 }
 0x1d1   : > { %v1045_v56 = vadd.f32 %v1675_v62, %v1044_v55  ;;  %v1116_v57 = vadd.f32 %v1745_v18, %v1115_v43 }
 0x1d2   : > { %v589_v58 = vpop.f32.mrf.mxu0 }
 0x1d3   : > { %v1062_v60 = vmax.f32 %v1045_v56, 0.0  ;;  %1243 = vst [vmem:[%s1732_s25 + $0xa8] sm:$0xff] %v1116_v57  ;;  %v590_v61 = vadd.f32 %v1656_v24, %v589_v58 }
 0x1d5   : > { %v609_v63 = vmax.f32 %v590_v61, 0.0  ;;  %v663_v1 = vpop.f32.mrf.mxu1  ;;  %1144 = vmatmul.f32.gmra.mxu3 %v1062_v60 }
 0x1d6   : > { %v664_v2 = vadd.f32 %v1727_v51, %v663_v1 }
 0x1d7   : > { %689 = vmatmul.f32.gmra.mxu1 %v609_v63 }
 0x1d8   : > { %701 = vst [vmem:[%s1732_s25 + $0x28] sm:$0xff] %v664_v2  ;;  %v1118_v3 = vpop.f32.mrf.mxu3 }
 0x1d9   : > { %v1119_v62 = vadd.f32 %v1745_v18, %v1118_v3 }
 0x1da   : > { %v592_v5 = vpop.f32.mrf.mxu0 }
 0x1db   : > { %1244 = vst [vmem:[%s1732_s25 + $0xb0] sm:$0xff] %v1119_v62  ;;  %v593_v6 = vadd.f32 %v1656_v24, %v592_v5 }
 0x1dd   : > { %v610_v7 = vmax.f32 %v593_v6, 0.0 }
 0x1df   : > { %692 = vmatmul.f32.gmra.mxu1 %v610_v7 }
 0x1e6   : > { %v666_v8 = vpop.f32.mrf.mxu1 }
 0x1e7   : > { %v667_v9 = vadd.f32 %v1727_v51, %v666_v8 }
 0x1e9   : > { %702 = vst [vmem:[%s1732_s25 + $0x30] sm:$0xff] %v667_v9  ;;  %v1121_v10 = vpop.f32.mrf.mxu3 }
 0x1ea   : > { %v1122_v11 = vadd.f32 %v1745_v18, %v1121_v10 }
 0x1ec   : > { %1245 = vst [vmem:[%s1732_s25 + $0xb8] sm:$0xff] %v1122_v11 }
 0x1ee   : > { %v669_v12 = vpop.f32.mrf.mxu1 }
 0x1ef   : > { %v670_v13 = vadd.f32 %v1727_v51, %v669_v12 }
 0x1f1   : > { %703 = vst [vmem:[%s1732_s25 + $0x38] sm:$0xff] %v670_v13 }
 0x1fa   : > { %v1124_v14 = vpop.f32.mrf.mxu3 }
 0x1fb   : > { %v1125_v24 = vadd.f32 %v1745_v18, %v1124_v14 }
 0x1fd   : > { %1246 = vst [vmem:[%s1732_s25 + $0xc0] sm:$0xff] %v1125_v24 }
 0x1ff   : > { %v672_v15 = vpop.f32.mrf.mxu1 }
 0x200   : > { %v673_v16 = vadd.f32 %v1727_v51, %v672_v15 }
 0x202   : > { %704 = vst [vmem:[%s1732_s25 + $0x40] sm:$0xff] %v673_v16 }
 0x203   : > { %v1127_v17 = vpop.f32.mrf.mxu3 }
 0x204   : > { %v1128_v19 = vadd.f32 %v1745_v18, %v1127_v17 }
 0x206   : > { %1247 = vst [vmem:[%s1732_s25 + $0xc8] sm:$0xff] %v1128_v19 }
 0x210   : > { %v675_v20 = vpop.f32.mrf.mxu1 }
 0x211   : > { %v676_v21 = vadd.f32 %v1727_v51, %v675_v20 }
 0x213   : > { %705 = vst [vmem:[%s1732_s25 + $0x48] sm:$0xff] %v676_v21 }
 0x214   : > { %v1130_v22 = vpop.f32.mrf.mxu3 }
 0x215   : > { %v1131_v23 = vadd.f32 %v1745_v18, %v1130_v22 }
 0x217   : > { %1248 = vst [vmem:[%s1732_s25 + $0xd0] sm:$0xff] %v1131_v23 }
 0x219   : > { %v678_v25 = vpop.f32.mrf.mxu1 }
 0x21a   : > { %v679_v26 = vadd.f32 %v1727_v51, %v678_v25 }
 0x21c   : > { %706 = vst [vmem:[%s1732_s25 + $0x50] sm:$0xff] %v679_v26  ;;  %v1133_v27 = vpop.f32.mrf.mxu3 }
 0x21d   : > { %v1134_v28 = vadd.f32 %v1745_v18, %v1133_v27 }
 0x21f   : > { %1249 = vst [vmem:[%s1732_s25 + $0xd8] sm:$0xff] %v1134_v28 }
 0x22a   : > { %v681_v29 = vpop.f32.mrf.mxu1 }
 0x22b   : > { %v682_v30 = vadd.f32 %v1727_v51, %v681_v29 }
 0x22d   : > { %707 = vst [vmem:[%s1732_s25 + $0x58] sm:$0xff] %v682_v30  ;;  %v1136_v53 = vpop.f32.mrf.mxu3 }
 0x22e   : > { %v1137_v31 = vadd.f32 %v1745_v18, %v1136_v53 }
 0x230   : > { %1250 = vst [vmem:[%s1732_s25 + $0xe0] sm:$0xff] %v1137_v31 }
 0x232   : > { %v684_v32 = vpop.f32.mrf.mxu1 }
 0x233   : > { %v685_v54 = vadd.f32 %v1727_v51, %v684_v32 }
 0x235   : > { %708 = vst [vmem:[%s1732_s25 + $0x60] sm:$0xff] %v685_v54 }
 0x23e   : > { %v1139_v33 = vpop.f32.mrf.mxu3 }
 0x23f   : > { %v1140_v59 = vadd.f32 %v1745_v18, %v1139_v33 }
 0x241   : > { %1251 = vst [vmem:[%s1732_s25 + $0xe8] sm:$0xff] %v1140_v59 }
 0x243   : > { %v687_v34 = vpop.f32.mrf.mxu1 }
 0x244   : > { %v688_v4 = vadd.f32 %v1727_v51, %v687_v34 }
 0x246   : > { %709 = vst [vmem:[%s1732_s25 + $0x68] sm:$0xff] %v688_v4 }
 0x247   : > { %v1142_v36 = vpop.f32.mrf.mxu3 }
 0x248   : > { %v1143_v37 = vadd.f32 %v1745_v18, %v1142_v36 }
 0x24a   : > { %1252 = vst [vmem:[%s1732_s25 + $0xf0] sm:$0xff] %v1143_v37 }
 0x254   : > { %v690_v0 = vpop.f32.mrf.mxu1 }
 0x255   : > { %v691_v38 = vadd.f32 %v1727_v51, %v690_v0 }
 0x257   : > { %710 = vst [vmem:[%s1732_s25 + $0x70] sm:$0xff] %v691_v38 }
 0x258   : > { %v1145_v40 = vpop.f32.mrf.mxu3 }
 0x259   : > { %v1146_v41 = vadd.f32 %v1745_v18, %v1145_v40 }
 0x25b   : > { %1253 = vst [vmem:[%s1732_s25 + $0xf8] sm:$0xff] %v1146_v41 }
 0x25c   : > { %v693_v42 = vpop.f32.mrf.mxu1 }
 0x25d   : > { %v694_v39 = vadd.f32 %v1727_v51, %v693_v42 }
 0x25f   : > { %711 = vst [vmem:[%s1732_s25 + $0x78] sm:$0xff] %v694_v39 }
 0x260 PF: > { %s17_s24 = sadd.s32 1, %s1317_s24  }
 0x261   : > { %p14_p4 = scmp.ge.s32.totalorder %s17_s24, 4  }
 0x263   :  { %16 = sbr.rel (!%p14_p4) target bundleno = 1 (0x1), region = 78 }

</bundles_post_ra>
